<compile_context>
chip_gen: v6e
topology: v6e:2x2x1
jax: 0.10.0
libtpu: 0.0.40
codegen_flags: <defaults>
</compile_context>

<pallas_src>
import functools

import jax
import jax.numpy as jnp
from jax.experimental import pallas as pl
from jax.experimental.pallas import tpu as pltpu

_CLAMP_MAX = 88.0


def _tanhexp_kernel(x_ref, o_ref, *, compute_dtype):
    x = x_ref[...].astype(compute_dtype)
    x = jnp.minimum(x, _CLAMP_MAX)                    # torch.clamp(inputs, max=88)
    o_ref[...] = (x * jnp.tanh(jnp.exp(x))).astype(o_ref.dtype)


def tanhexp_ref(x: jax.Array) -> jax.Array:
    """Pure-JAX reference mirroring the PyTorch forward (f32 intermediates)."""
    xf = jnp.minimum(x.astype(jnp.float32), _CLAMP_MAX)
    return (xf * jnp.tanh(jnp.exp(xf))).astype(x.dtype)


def _round_down(v: int, m: int) -> int:
    return (v // m) * m


def _round_up(v: int, m: int) -> int:
    return ((v + m - 1) // m) * m


def _sublane_multiple(itemsize: int) -> int:
    # Native (sublane, 128) tile: (8,128) f32, (16,128) bf16/f16, (32,128) 8-bit.
    return {4: 8, 2: 16, 1: 32}.get(itemsize, 8)


def _bf16_math_ok() -> bool:
    """bf16 VPU/EUP exists on v6e/v7x; upcast to f32 on older chips / non-TPU."""
    try:
        kind = jax.devices()[0].device_kind.lower()
    except Exception:
        return False
    if "tpu" not in kind and not kind.startswith("v"):
        return False
    return not any(old in kind for old in ("v2", "v3", "v4", "v5"))


def tanhexp(
    x: jax.Array,
    *,
    target_block_bytes: int = 8 * 1024 * 1024,
    min_pallas_elements: int = 256 * 1024,
    vmem_limit_bytes: int = 48 * 1024 * 1024,
    donate_input: bool = False,
) -> jax.Array:
    """Applies TanhExp elementwise. Accepts any shape; preserves shape & dtype."""
    orig_shape = x.shape
    orig_dtype = x.dtype
    n = x.size
    if n == 0:
        return x

    # Tiny activations: fused pure-JAX path beats a pallas_call's launch cost.
    if n < min_pallas_elements:
        return tanhexp_ref(x)

    itemsize = jnp.dtype(orig_dtype).itemsize
    sub = _sublane_multiple(itemsize)

    # Lane-dense slab: largest multiple of 128 (<= 2048) that divides n.
    cols = 0
    for c in range(2048, 127, -128):
        if n % c == 0:
            cols = c
            break
    if cols == 0:
        # Rare: element count not a multiple of 128.  Padding/slicing around the
        # kernel would add a full extra HBM read+write to a bandwidth-bound op,
        # so the fused XLA elementwise path is faster here.
        return tanhexp_ref(x)

    rows = n // cols
    x2 = x.reshape(rows, cols)
    bytes_per_row = cols * itemsize

    # Row tile: dtype-aware sublane multiple, ~target_block_bytes per block,
    # even block count (>= 2) so v7x's two TensorCores stay balanced.
    if rows <= sub or rows * bytes_per_row <= target_block_bytes:
        tile_r = rows                                   # single block == full dims
    else:
        tile_r = max(sub, _round_down(target_block_bytes // bytes_per_row, sub))
        tile_r = min(tile_r, _round_down(rows, sub))
        nblk = pl.cdiv(rows, tile_r)
        if nblk % 2 == 1 and nblk < 8:
            cand = max(sub, _round_up(pl.cdiv(rows, nblk + 1), sub))
            if cand <= rows and pl.cdiv(rows, cand) % 2 == 0:
                tile_r = cand

    grid = (pl.cdiv(rows, tile_r),)

    # bf16-native math where the hardware supports it; f32 upcast otherwise.
    if orig_dtype == jnp.bfloat16 and _bf16_math_ok():
        compute_dtype = jnp.bfloat16
    else:
        compute_dtype = jnp.float32

    kernel = functools.partial(_tanhexp_kernel, compute_dtype=compute_dtype)

    out = pl.pallas_call(
        kernel,
        out_shape=jax.ShapeDtypeStruct((rows, cols), orig_dtype),
        grid_spec=pl.GridSpec(
            grid=grid,
            in_specs=[pl.BlockSpec((tile_r, cols), lambda i: (i, 0))],
            out_specs=pl.BlockSpec((tile_r, cols), lambda i: (i, 0)),
        ),
        compiler_params=pltpu.CompilerParams(
            dimension_semantics=("parallel",),
            # double-buffered in+out of an ~8 MiB block ~= 32 MiB; headroom under
            # v7x's 64 MiB per-TC VMEM, trivially under v5e/v6e's 128 MiB.
            vmem_limit_bytes=vmem_limit_bytes,
        ),
        input_output_aliases={0: 0} if donate_input else {},
    )(x2)

    return out.reshape(orig_shape)


# TODO(synk): custom backward (FuncTanhExp.backward) is not implemented; forward only.

if __name__ == "__main__":
    key = jax.random.PRNGKey(0)
    keys = jax.random.split(key, 4)

    # 1) Main case: tiny NCHW conv-activation tensor -> fused pure-JAX fast path.
    x = jax.random.normal(keys[0], (2, 4, 16, 16), dtype=jnp.float32) * 3.0
    x = x.at[0, 0, 0, 0].set(100.0)                    # exercise clamp-at-88
    y = jax.block_until_ready(tanhexp(x))
    y_ref = tanhexp_ref(x)
    assert y.shape == x.shape and y.dtype == x.dtype
    assert jnp.allclose(y, y_ref, atol=1e-4, rtol=1e-4), "mismatch (main, jax path)"

    # Same tensor forced through the Pallas kernel (single full block).
    y_k = jax.block_until_ready(tanhexp(x, min_pallas_elements=0))
    assert jnp.allclose(y_k, y_ref, atol=1e-4, rtol=1e-4), "mismatch (main, pallas)"

    # 2) f32 slab large enough for a multi-block parallel grid (even block count).
    xb = jax.random.normal(keys[1], (512, 1024), dtype=jnp.float32) * 2.0
    yb = jax.block_until_ready(
        tanhexp(xb, min_pallas_elements=0, target_block_bytes=256 * 1024))
    assert jnp.allclose(yb, tanhexp_ref(xb), atol=1e-4, rtol=1e-4), "mismatch (f32 grid)"

    # Donated-buffer variant: input_output_aliases={0: 0} under jit donation.
    donate_fn = jax.jit(
        functools.partial(tanhexp, min_pallas_elements=0,
                          target_block_bytes=256 * 1024, donate_input=True),
        donate_argnums=0)
    xb_copy = xb + 0.0
    yd = jax.block_until_ready(donate_fn(xb_copy))
    assert jnp.allclose(yd, tanhexp_ref(xb), atol=1e-4, rtol=1e-4), "mismatch (donated)"

    # 3) bf16 input: dtype-aware (16,128) sublane tiling + bf16-native EUP math
    #    on v6e/v7x (f32 upcast on older chips).
    xh = (jax.random.normal(keys[2], (256, 2048), dtype=jnp.float32) * 3.0
          ).astype(jnp.bfloat16)
    yh = jax.block_until_ready(
        tanhexp(xh, min_pallas_elements=0, target_block_bytes=128 * 1024))
    assert yh.dtype == jnp.bfloat16 and yh.shape == xh.shape
    assert jnp.allclose(yh.astype(jnp.float32), tanhexp_ref(xh).astype(jnp.float32),
                        atol=5e-2, rtol=5e-2), "mismatch (bf16)"

    # 4) Awkward shapes (tiny / non-multiple-of-128 element counts) take the
    #    fused pure-JAX path by design — correctness still holds.
    x_small = jax.random.normal(keys[3], (3, 5, 7), dtype=jnp.float32)
    assert jnp.allclose(tanhexp(x_small), tanhexp_ref(x_small), atol=1e-4, rtol=1e-4)
    x_odd = jax.random.normal(keys[3], (5, 999), dtype=jnp.float32) * 2.0
    assert jnp.allclose(tanhexp(x_odd), tanhexp_ref(x_odd), atol=1e-4, rtol=1e-4)

    print("KERNEL_OK")
</pallas_src>

<mosaic_0001>
module attributes {stable_mosaic.version = 11 : i64} {
  func.func @_tanhexp_kernel(%arg0: i32, %arg1: memref<1x2048xf32, #tpu.memory_space<vmem>>, %arg2: memref<1x2048xf32, #tpu.memory_space<vmem>>) attributes {dimension_semantics = [#tpu.dimension_semantics<parallel>], iteration_bounds = array<i64: 1>, scalar_prefetch = 0 : i64, scratch_operands = 0 : i64, tpu.core_type = #tpu.core_type<tc>, window_params = [{transform_indices = @transform_0, window_bounds = array<i64: 1, 2048>}, {transform_indices = @transform_1, window_bounds = array<i64: 1, 2048>}]} {
    %c0 = arith.constant 0 : index
    %c0_0 = arith.constant 0 : index
    %0 = vector.load %arg1[%c0, %c0_0] : memref<1x2048xf32, #tpu.memory_space<vmem>>, vector<1x2048xf32>
    %cst = arith.constant 8.800000e+01 : f32
    %1 = vector.broadcast %cst : f32 to vector<1x2048xf32>
    %2 = arith.minimumf %0, %1 : vector<1x2048xf32>
    %3 = math.exp %2 : vector<1x2048xf32>
    %4 = math.tanh %3 : vector<1x2048xf32>
    %5 = arith.mulf %2, %4 : vector<1x2048xf32>
    %c0_1 = arith.constant 0 : index
    %c0_2 = arith.constant 0 : index
    %6 = vector.load %arg2[%c0_1, %c0_2] : memref<1x2048xf32, #tpu.memory_space<vmem>>, vector<1x2048xf32>
    tpu.vector_store %arg2[%c0_1, %c0_2], %5 {strides = array<i32>} : memref<1x2048xf32, #tpu.memory_space<vmem>>, vector<1x2048xf32>,
    return
  }
  func.func @transform_0(%arg0: i32) -> (i32, i32) {
    %c0_i32 = arith.constant 0 : i32
    %c0_i32_0 = arith.constant 0 : i32
    return %arg0, %c0_i32 : i32, i32
  }
  func.func @transform_1(%arg0: i32) -> (i32, i32) {
    %c0_i32 = arith.constant 0 : i32
    %c0_i32_0 = arith.constant 0 : i32
    return %arg0, %c0_i32 : i32, i32
  }
}

</mosaic_0001>

<bundles_post_ra>
// kernel: tpu_custom_call.1
= control target key start
LH: loop header
LB: loop body
LE: loop exit
PB: predicated region body
PF: predicated region fallthrough
CT: control target
= control target key end

     0   :  { %6 = vsyncpa [#allocation3], 0  ;;  %s122_s0 = inlined_call_operand.hbm [shape: f32[1,2048], index: 0, kind: input, shape index: {}]   ;;  %s123_s1 = inlined_call_operand.hbm [shape: f32[1,2048], index: 1, kind: output, shape index: {}]  }
   0x1   :  { %7 = vsyncpa [#allocation4], 0  ;;  %s104_s6 = smov [#allocation2]  }
   0x2   :  { %s14_s7 = sshll.u32 %s104_s6, 4  ;;  %s15_s7 = int_to_ptr.vmem [resolvable:$true] %s14_s7 }
   0x3   :  { %s68_s8 = scalar_lea.vmem %s15_s7, 256  ;;  %p73_p1 = scmp.lt.s32.totalorder %s15_s7, %s15_s7 }
   0x4   :  { %p69_p0 = scmp.ne.s32.totalorder %s15_s7, %s68_s8  ;;  %p74_p2 = scmp.lt.s32.totalorder %s68_s8, %s68_s8 }
   0x6   :  { %p75_p3 = por %p74_p2, %p73_p1 }
   0x8   :  { %p76_p4 = pnand %p75_p3, %p69_p0 }
   0xa   :  { %79 = shalt.err (!%p76_p4)
}
   0xb   :  { %17 = dma.hbm_to_vmem [thread:$0]  %s122_s0, 256, %s15_s7, [#allocation3]  }
   0xc   :  { %100 = dma.done.wait [#allocation3], 256  }
   0xd   :  { %101 = vsyncadd [#allocation3], 4294967040  ;;  %v21_v0 = vld [vmem:[#allocation2] sm:$0xff]  ;;  %v22_v1 = vld [vmem:[#allocation2 + $0x8] sm:$0xff]  ;;  %s105_s11 = smov [#allocation5]  }
   0xe   :  { %v23_v2 = vmin.f32 %v21_v0, 88.0  ;;  %v24_v3 = vmin.f32 %v22_v1, 88.0  ;;  %s41_s12 = sshll.u32 %s105_s11, 4  ;;  %s42_s12 = int_to_ptr.vmem [resolvable:$true] %s41_s12 }
   0xf   :  { %s80_s0 = scalar_lea.vmem %s42_s12, 256  ;;  %p85_p6 = scmp.lt.s32.totalorder %s42_s12, %s42_s12 }
  0x10   :  { %v25_v4 = vmul.f32 1.442695, %v23_v2  ;;  %v27_v5 = vmul.f32 1.442695, %v24_v3  ;;  %p81_p5 = scmp.ne.s32.totalorder %s42_s12, %s80_s0  ;;  %p86_p7 = scmp.lt.s32.totalorder %s80_s0, %s80_s0 }
  0x12   :  { %52 = vpow2.f32 %v25_v4  ;;  %p87_p8 = por %p86_p7, %p85_p6 }
  0x13   :  { %54 = vpow2.f32 %v27_v5 }
  0x14   :  { %p88_p9 = pnand %p87_p8, %p81_p5 }
  0x1f   :  { %v53_v6 = vpop.eup %52 }
  0x20   :  { %v55_v7 = vpop.eup %54  ;;  %56 = vtanh.f32 %v53_v6 }
  0x21   :  { %58 = vtanh.f32 %v55_v7 }
  0x2d   :  { %v57_v8 = vpop.eup %56 }
  0x2e   :  { %v59_v9 = vpop.eup %58  ;;  %v31_v10 = vmul.f32 %v57_v8, %v23_v2 }
  0x2f   :  { %v32_v11 = vmul.f32 %v59_v9, %v24_v3 }
  0x30   :  { %33 = vst [vmem:[#allocation5] sm:$0xff] %v31_v10 }
  0x31   :  { %34 = vst [vmem:[#allocation5 + $0x8] sm:$0xff] %v32_v11 }
  0x32   :  { %91 = shalt.err (!%p88_p9)
}
  0x33   :  { %44 = dma.vmem_to_hbm [thread:$0]  %s42_s12, 256, %s123_s1, [#allocation4]  }
  0x34   :  { %102 = dma.done.wait [#allocation4], 256  }
  0x35   :  { %103 = vsyncadd [#allocation4], 4294967040 }
  0x36   :  { %48 = vsyncpa [#allocation3], 1 }
  0x37   :  { %49 = vsyncpa [#allocation4], 1 }

</bundles_post_ra>
